<compile_context>
chip_gen: v7x
topology: tpu7x:2x2x1
jax: 0.10.0
libtpu: 0.0.40
codegen_flags: <defaults>
</compile_context>

<pallas_src>
import functools

import jax
import jax.numpy as jnp
from jax.experimental import pallas as pl
from jax.experimental.pallas import tpu as pltpu

EPS = 1e-5


def _round_up(x, m):
    return (x + m - 1) // m * m


# ---------------------------- fused matmul kernels ----------------------------

def _mm_bn_act_kernel(x_ref, w_ref, s_ref, b_ref, o_ref, acc_ref, *, act):
    k = pl.program_id(2)

    @pl.when(k == 0)
    def _():
        acc_ref[...] = jnp.zeros_like(acc_ref)

    acc_ref[...] += jnp.dot(x_ref[...], w_ref[...],
                            preferred_element_type=jnp.float32)

    @pl.when(k == pl.num_programs(2) - 1)
    def _():
        y = acc_ref[...] * s_ref[...] + b_ref[...]
        if act == "relu":
            y = jnp.maximum(y, 0.0)
        elif act == "tanh":
            y = jnp.tanh(y)
        o_ref[...] = y.astype(o_ref.dtype)


def _mm_bn_act_res_kernel(x_ref, w_ref, s_ref, b_ref, r_ref, o_ref, acc_ref, *, act):
    k = pl.program_id(2)

    @pl.when(k == 0)
    def _():
        acc_ref[...] = jnp.zeros_like(acc_ref)

    acc_ref[...] += jnp.dot(x_ref[...], w_ref[...],
                            preferred_element_type=jnp.float32)

    @pl.when(k == pl.num_programs(2) - 1)
    def _():
        y = acc_ref[...] * s_ref[...] + b_ref[...] + r_ref[...].astype(jnp.float32)
        if act == "relu":
            y = jnp.maximum(y, 0.0)
        elif act == "tanh":
            y = jnp.tanh(y)
        o_ref[...] = y.astype(o_ref.dtype)


def _pick_tiles(M, K, N, max_tk=2048, max_tn=512):
    """Adaptive tiles: minimal padding, few K steps, >=2 blocks on a parallel axis."""
    tm = min(128, _round_up(M, 8))
    mp = _round_up(M, tm)
    tn = min(max_tn, _round_up(N, 128))
    np_ = _round_up(N, tn)
    # Expose >=2 parallel blocks when cheap (v7x has 2 TensorCores per chip).
    if mp // tm == 1 and np_ // tn == 1:
        if tn % 256 == 0:
            tn //= 2
        elif tm % 16 == 0:
            tm //= 2
    kp = _round_up(K, 128)
    if kp <= max_tk:
        tk = kp
    else:
        nk = -(-kp // max_tk)               # ceil
        tk = _round_up(-(-kp // nk), 128)
        kp = nk * tk
    return tm, tk, tn, mp, kp, np_


def fused_matmul_bn_act(x, w, scale, bias, act="none", res=None,
                        out_dtype=jnp.bfloat16):
    """(x @ w) * scale + bias (+ res) then activation.

    x:[M,K], w:[K,N], scale/bias:[N], res (optional):[M,N].
    Operands are cast to bf16 (MXU), accumulation & epilogue stay f32.
    """
    M, K = x.shape
    _, N = w.shape
    tm, tk, tn, Mp, Kp, Np = _pick_tiles(M, K, N)

    xp = jnp.pad(x.astype(jnp.bfloat16), ((0, Mp - M), (0, Kp - K)))
    wp = jnp.pad(w.astype(jnp.bfloat16), ((0, Kp - K), (0, Np - N)))
    sp = jnp.pad(scale.astype(jnp.float32), (0, Np - N)).reshape(1, Np)
    bp = jnp.pad(bias.astype(jnp.float32), (0, Np - N)).reshape(1, Np)

    in_specs = [
        pl.BlockSpec((tm, tk), lambda i, j, k: (i, k)),
        pl.BlockSpec((tk, tn), lambda i, j, k: (k, j)),
        pl.BlockSpec((1, tn), lambda i, j, k: (0, j)),
        pl.BlockSpec((1, tn), lambda i, j, k: (0, j)),
    ]
    args = [xp, wp, sp, bp]
    if res is not None:
        rp = jnp.pad(res.astype(jnp.bfloat16), ((0, Mp - M), (0, Np - N)))
        in_specs.append(pl.BlockSpec((tm, tn), lambda i, j, k: (i, j)))
        args.append(rp)
        kern = functools.partial(_mm_bn_act_res_kernel, act=act)
    else:
        kern = functools.partial(_mm_bn_act_kernel, act=act)

    grid = (Mp // tm, Np // tn, Kp // tk)
    out = pl.pallas_call(
        kern,
        out_shape=jax.ShapeDtypeStruct((Mp, Np), out_dtype),
        grid_spec=pltpu.PrefetchScalarGridSpec(
            num_scalar_prefetch=0,
            grid=grid,
            in_specs=in_specs,
            out_specs=pl.BlockSpec((tm, tn), lambda i, j, k: (i, j)),
            scratch_shapes=[pltpu.VMEM((tm, tn), jnp.float32)],
        ),
        compiler_params=pltpu.CompilerParams(
            dimension_semantics=("parallel", "parallel", "arbitrary")),
    )(*args)
    if Mp != M or Np != N:
        out = out[:M, :N]
    return out


# ---------------------------- encoder conv (im2col) ----------------------------

def _im2col(x, k, stride, pad):
    n, h, w, c = x.shape
    xp = jnp.pad(x, ((0, 0), (pad, pad), (pad, pad), (0, 0)))
    ho = (h + 2 * pad - k) // stride + 1
    wo = (w + 2 * pad - k) // stride + 1
    cols = []
    for i in range(k):
        for j in range(k):
            cols.append(xp[:, i:i + stride * ho:stride, j:j + stride * wo:stride, :])
    patches = jnp.stack(cols, axis=3)  # [n, ho, wo, k*k, c]
    return patches.reshape(n * ho * wo, k * k * c), (n, ho, wo)


def conv2d_bn_act(x, w_oihw, scale, bias, stride, pad, act, res=None,
                  out_dtype=jnp.bfloat16):
    """x: NHWC, w: PyTorch [Cout, Cin, kh, kw].  Optional fused residual (NHWC)."""
    cout, cin, kh, kw = w_oihw.shape
    patches, (n, ho, wo) = _im2col(x, kh, stride, pad)
    wm = jnp.transpose(w_oihw, (2, 3, 1, 0)).reshape(kh * kw * cin, cout)
    r = None if res is None else res.reshape(n * ho * wo, cout)
    out = fused_matmul_bn_act(patches, wm, scale, bias, act, res=r,
                              out_dtype=out_dtype)
    return out.reshape(n, ho, wo, cout)


# ---------------------------- decoder ConvTranspose (per-tap) ----------------------------

def _convt_tap_kernel(x_ref, w_ref, s_ref, b_ref, o_ref, acc_ref, *,
                      kh, wo, rows, act):
    j = pl.program_id(1)

    @pl.when(j == 0)
    def _():
        acc_ref[...] = jnp.zeros_like(acc_ref)

    # Accumulate kh taps for this kj column-shift; all slices are static/aligned.
    for ki in range(kh):
        xm = x_ref[0, pl.ds(ki * wo, rows), :]          # [Ho*Wo, Cin]
        acc_ref[...] += jnp.dot(xm, w_ref[0, ki],
                                preferred_element_type=jnp.float32)

    @pl.when(j == pl.num_programs(1) - 1)
    def _():
        y = acc_ref[...] * s_ref[...] + b_ref[...]
        if act == "relu":
            y = jnp.maximum(y, 0.0)
        elif act == "tanh":
            y = jnp.tanh(y)
        o_ref[...] = y.astype(o_ref.dtype)


def conv_transpose2d_bn_act(x, w_iokk, scale, bias, act, out_dtype=jnp.bfloat16):
    """ConvTranspose2d(stride=1, padding=0) + folded BN + act, no im2col blowup.

    x: NHWC [N,Hi,Wi,Cin]; w: PyTorch ConvTranspose layout [Cin, Cout, kh, kw].
    """
    n, hi, wi, cin = x.shape
    _, cout, kh, kw = w_iokk.shape
    p = kh - 1
    ho, wo = hi + kh - 1, wi + kw - 1
    hp = hi + 2 * p

    # kw column-shifted views of the padded input, flattened to [kw, N*Hp*Wo, Cin].
    xp = jnp.pad(x.astype(jnp.bfloat16), ((0, 0), (p, p), (p, p), (0, 0)))
    xcols = jnp.stack([xp[:, :, j:j + wo, :] for j in range(kw)], axis=0)
    xcols = xcols.reshape(kw, n * hp * wo, cin)

    # Flipped kernel (equivalent full correlation), arranged [kw, kh, Cin, Cout].
    wk = jnp.transpose(w_iokk[:, :, ::-1, ::-1], (3, 2, 0, 1)).astype(jnp.bfloat16)
    sp = scale.astype(jnp.float32).reshape(1, cout)
    bp = bias.astype(jnp.float32).reshape(1, cout)

    rows = ho * wo
    out = pl.pallas_call(
        functools.partial(_convt_tap_kernel, kh=kh, wo=wo, rows=rows, act=act),
        out_shape=jax.ShapeDtypeStruct((n * rows, cout), out_dtype),
        grid_spec=pltpu.PrefetchScalarGridSpec(
            num_scalar_prefetch=0,
            grid=(n, kw),
            in_specs=[
                pl.BlockSpec((1, hp * wo, cin), lambda b, j: (j, b, 0)),
                pl.BlockSpec((1, kh, cin, cout), lambda b, j: (j, 0, 0, 0)),
                pl.BlockSpec((1, cout), lambda b, j: (0, 0)),
                pl.BlockSpec((1, cout), lambda b, j: (0, 0)),
            ],
            out_specs=pl.BlockSpec((rows, cout), lambda b, j: (b, 0)),
            scratch_shapes=[pltpu.VMEM((rows, cout), jnp.float32)],
        ),
        compiler_params=pltpu.CompilerParams(
            dimension_semantics=("parallel", "arbitrary")),
    )(xcols, wk, sp, bp)
    return out.reshape(n, ho, wo, cout)


# ---------------------------- avg pool 2x2 (global at 2x2 input) ----------------------------

def _avgpool_kernel(x_ref, o_ref):
    xs = x_ref[...].astype(jnp.float32)      # [n, h*w, c]
    acc = xs[:, 0, :]
    for t in range(1, xs.shape[1]):
        acc = acc + xs[:, t, :]
    o_ref[...] = acc * (1.0 / xs.shape[1])


def avg_pool_2x2(x):
    """x: [N,2,2,C] -> [N,C]  (== F.avg_pool2d(out, 2) at 2x2 spatial)."""
    n, h, w, c = x.shape
    xr = x.reshape(n, h * w, c)
    return pl.pallas_call(
        _avgpool_kernel,
        out_shape=jax.ShapeDtypeStruct((n, c), jnp.float32),
        grid_spec=pltpu.PrefetchScalarGridSpec(
            num_scalar_prefetch=0,
            grid=(1,),
            in_specs=[pl.BlockSpec((n, h * w, c), lambda i: (0, 0, 0))],
            out_specs=pl.BlockSpec((n, c), lambda i: (0, 0)),
        ),
    )(xr)


# ---------------------------- parameters ----------------------------

def _bn_params(nrm, c):
    gamma = 1.0 + nrm((c,), 0.05)
    beta = nrm((c,), 0.05)
    mean = nrm((c,), 0.05)
    var = 1.0 + jnp.abs(nrm((c,), 0.05))
    return gamma, beta, mean, var


def _fold_bn(bn, conv_bias=None):
    gamma, beta, mean, var = bn
    scale = gamma / jnp.sqrt(var + EPS)
    bias = beta - mean * scale
    if conv_bias is not None:
        bias = bias + conv_bias * scale
    return scale, bias


def make_params(seed=42):
    base = jax.random.PRNGKey(seed)
    counter = [0]

    def nrm(shape, scale=0.05):
        counter[0] += 1
        return scale * jax.random.normal(jax.random.fold_in(base, counter[0]),
                                         shape, jnp.float32)

    P = {}
    # ResNet18 encoder (CIFAR-style 3x3 stem, all stage strides = 2).
    P["stem_w"] = nrm((64, 3, 3, 3))
    P["stem_s"], P["stem_b"] = _fold_bn(_bn_params(nrm, 64))

    blocks = []
    in_planes = 64
    for planes, num_blocks, stride in [(64, 2, 2), (128, 2, 2),
                                       (256, 2, 2), (512, 2, 2)]:
        for s in [stride] + [1] * (num_blocks - 1):
            blk = {"stride": s}
            blk["conv1_w"] = nrm((planes, in_planes, 3, 3))
            blk["bn1_s"], blk["bn1_b"] = _fold_bn(_bn_params(nrm, planes))
            blk["conv2_w"] = nrm((planes, planes, 3, 3))
            blk["bn2_s"], blk["bn2_b"] = _fold_bn(_bn_params(nrm, planes))
            if s != 1 or in_planes != planes:
                blk["sc_w"] = nrm((planes, in_planes, 1, 1))
                blk["sc_s"], blk["sc_b"] = _fold_bn(_bn_params(nrm, planes))
            blocks.append(blk)
            in_planes = planes
    P["blocks"] = blocks

    # Decoder: ConvT(512,256,4) BN ReLU; ConvT(256,128,5) BN ReLU;
    #          ConvT(128,64,9) BN ReLU; ConvT(64,3,17) Tanh.
    dec = []
    for cin, cout, k, has_bn, act in [(512, 256, 4, True, "relu"),
                                      (256, 128, 5, True, "relu"),
                                      (128, 64, 9, True, "relu"),
                                      (64, 3, 17, False, "tanh")]:
        w = nrm((cin, cout, k, k))
        b = nrm((cout,), 0.05)
        if has_bn:
            scale, bias = _fold_bn(_bn_params(nrm, cout), conv_bias=b)
        else:
            scale, bias = jnp.ones((cout,), jnp.float32), b
        dec.append({"w": w, "scale": scale, "bias": bias, "act": act})
    P["decoder"] = dec
    return P


# ---------------------------- forward ----------------------------

def basic_block_forward(x, blk):
    s = blk["stride"]
    out1 = conv2d_bn_act(x, blk["conv1_w"], blk["bn1_s"], blk["bn1_b"],
                         s, 1, "relu")
    if "sc_w" in blk:
        sc = conv2d_bn_act(x, blk["sc_w"], blk["sc_s"], blk["sc_b"],
                           s, 0, "none")
    else:
        sc = x
    # conv2 + BN + residual add + ReLU fused into a single kernel epilogue.
    out = conv2d_bn_act(out1, blk["conv2_w"], blk["bn2_s"], blk["bn2_b"],
                        1, 1, "relu", res=sc)
    return out


def resae_forward(x_nchw, P):
    x = jnp.transpose(x_nchw, (0, 2, 3, 1)).astype(jnp.bfloat16)  # NCHW -> NHWC
    out = conv2d_bn_act(x, P["stem_w"], P["stem_s"], P["stem_b"], 1, 1, "relu")
    for blk in P["blocks"]:
        out = basic_block_forward(out, blk)

    pooled = avg_pool_2x2(out)                 # [N, 512] f32 latent
    n = pooled.shape[0]
    x1 = pooled.reshape(n, 1, 1, 512)

    # Decoder layer 1: ConvT(512,256,4) on a 1x1 map == one lane-dense matmul.
    d1 = P["decoder"][0]
    cin, cout, k, _ = d1["w"].shape
    w_r = jnp.transpose(d1["w"], (0, 2, 3, 1)).reshape(cin, k * k * cout)
    s_r = jnp.tile(d1["scale"], k * k)
    b_r = jnp.tile(d1["bias"], k * k)
    dec = fused_matmul_bn_act(pooled, w_r, s_r, b_r, act=d1["act"])
    dec = dec.reshape(n, k, k, cout)

    # Remaining decoder layers: per-tap ConvTranspose kernel (no im2col blowup).
    last = P["decoder"][-1]
    for layer in P["decoder"][1:]:
        dec = conv_transpose2d_bn_act(
            dec, layer["w"], layer["scale"], layer["bias"], layer["act"],
            out_dtype=jnp.float32 if layer is last else jnp.bfloat16)

    x1_nchw = jnp.transpose(x1, (0, 3, 1, 2)).astype(jnp.float32)   # [N,512,1,1]
    x_rec_nchw = jnp.transpose(dec, (0, 3, 1, 2)).astype(jnp.float32)  # [N,3,32,32]
    return x1_nchw, x_rec_nchw


if __name__ == "__main__":
    P = make_params()
    x = jax.random.normal(jax.random.PRNGKey(0), (2, 3, 32, 32), jnp.float32)
    x1, x_rec = resae_forward(x, P)
    jax.block_until_ready((x1, x_rec))
    assert x1.shape == (2, 512, 1, 1), x1.shape
    assert x_rec.shape == (2, 3, 32, 32), x_rec.shape
    assert bool(jnp.isfinite(x1).all()) and bool(jnp.isfinite(x_rec).all())
    print("KERNEL_OK")
</pallas_src>

<mosaic_0001>
module attributes {stable_mosaic.version = 11 : i64} {
  func.func @_mm_bn_act_kernel(%arg0: i32, %arg1: i32, %arg2: i32, %arg3: memref<128x128xbf16, #tpu.memory_space<vmem>>, %arg4: memref<128x128xbf16, #tpu.memory_space<vmem>>, %arg5: memref<1x128xf32, #tpu.memory_space<vmem>>, %arg6: memref<1x128xf32, #tpu.memory_space<vmem>>, %arg7: memref<128x128xbf16, #tpu.memory_space<vmem>>, %arg8: memref<128x128xf32, #tpu.memory_space<vmem>>) attributes {dimension_semantics = [#tpu.dimension_semantics<parallel>, #tpu.dimension_semantics<parallel>, #tpu.dimension_semantics<arbitrary>], iteration_bounds = array<i64: 16, 1, 1>, scalar_prefetch = 0 : i64, scratch_operands = 1 : i64, tpu.core_type = #tpu.core_type<tc>, window_params = [{transform_indices = @transform_0, window_bounds = array<i64: 128, 128>}, {transform_indices = @transform_1, window_bounds = array<i64: 128, 128>}, {transform_indices = @transform_2, window_bounds = array<i64: 1, 128>}, {transform_indices = @transform_3, window_bounds = array<i64: 1, 128>}, {transform_indices = @transform_4, window_bounds = array<i64: 128, 128>}]} {
    %c0_i32 = arith.constant 0 : i32
    %0 = arith.cmpi eq, %arg2, %c0_i32 : i32
    %1 = arith.extui %0 : i1 to i32
    %c0_i32_0 = arith.constant 0 : i32
    %2 = arith.cmpi ne, %1, %c0_i32_0 : i32
    scf.if %2 {
      %cst_10 = arith.constant 0.000000e+00 : f32
      %12 = vector.broadcast %cst_10 : f32 to vector<128x128xf32>
      %c0_11 = arith.constant 0 : index
      %c0_12 = arith.constant 0 : index
      %13 = vector.load %arg8[%c0_11, %c0_12] : memref<128x128xf32, #tpu.memory_space<vmem>>, vector<128x128xf32>
      tpu.vector_store %arg8[%c0_11, %c0_12], %12 {strides = array<i32>} : memref<128x128xf32, #tpu.memory_space<vmem>>, vector<128x128xf32>,
    } else {
    }
    %c0 = arith.constant 0 : index
    %c0_1 = arith.constant 0 : index
    %3 = vector.load %arg8[%c0, %c0_1] : memref<128x128xf32, #tpu.memory_space<vmem>>, vector<128x128xf32>
    %c0_2 = arith.constant 0 : index
    %c0_3 = arith.constant 0 : index
    %4 = vector.load %arg3[%c0_2, %c0_3] : memref<128x128xbf16, #tpu.memory_space<vmem>>, vector<128x128xbf16>
    %c0_4 = arith.constant 0 : index
    %c0_5 = arith.constant 0 : index
    %5 = vector.load %arg4[%c0_4, %c0_5] : memref<128x128xbf16, #tpu.memory_space<vmem>>, vector<128x128xbf16>
    %cst = arith.constant dense<0.000000e+00> : vector<128x128xf32>
    %6 = tpu.matmul %4, %5, %cst {dimension_numbers = #tpu.dot_dimension_numbers<[1], [0], [0], [1], [0, 0, 1, 1], [], []>} : vector<128x128xbf16>, vector<128x128xbf16>, vector<128x128xf32> -> vector<128x128xf32>
    %7 = arith.addf %3, %6 : vector<128x128xf32>
    %c0_6 = arith.constant 0 : index
    %c0_7 = arith.constant 0 : index
    %8 = vector.load %arg8[%c0_6, %c0_7] : memref<128x128xf32, #tpu.memory_space<vmem>>, vector<128x128xf32>
    tpu.vector_store %arg8[%c0_6, %c0_7], %7 {strides = array<i32>} : memref<128x128xf32, #tpu.memory_space<vmem>>, vector<128x128xf32>,
    %c0_i32_8 = arith.constant 0 : i32
    %9 = arith.cmpi eq, %arg2, %c0_i32_8 : i32
    %10 = arith.extui %9 : i1 to i32
    %c0_i32_9 = arith.constant 0 : i32
    %11 = arith.cmpi ne, %10, %c0_i32_9 : i32
    scf.if %11 {
      %c0_10 = arith.constant 0 : index
      %c0_11 = arith.constant 0 : index
      %12 = vector.load %arg8[%c0_10, %c0_11] : memref<128x128xf32, #tpu.memory_space<vmem>>, vector<128x128xf32>
      %c0_12 = arith.constant 0 : index
      %c0_13 = arith.constant 0 : index
      %13 = vector.load %arg5[%c0_12, %c0_13] : memref<1x128xf32, #tpu.memory_space<vmem>>, vector<1x128xf32>
      %14 = vector.broadcast %13 : vector<1x128xf32> to vector<128x128xf32>
      %15 = arith.mulf %12, %14 : vector<128x128xf32>
      %c0_14 = arith.constant 0 : index
      %c0_15 = arith.constant 0 : index
      %16 = vector.load %arg6[%c0_14, %c0_15] : memref<1x128xf32, #tpu.memory_space<vmem>>, vector<1x128xf32>
      %17 = vector.broadcast %16 : vector<1x128xf32> to vector<128x128xf32>
      %18 = arith.addf %15, %17 : vector<128x128xf32>
      %cst_16 = arith.constant 0.000000e+00 : f32
      %19 = vector.broadcast %cst_16 : f32 to vector<128x128xf32>
      %20 = arith.maximumf %18, %19 : vector<128x128xf32>
      %21 = arith.truncf %20 : vector<128x128xf32> to vector<128x128xbf16>
      %c0_17 = arith.constant 0 : index
      %c0_18 = arith.constant 0 : index
      %22 = vector.load %arg7[%c0_17, %c0_18] : memref<128x128xbf16, #tpu.memory_space<vmem>>, vector<128x128xbf16>
      tpu.vector_store %arg7[%c0_17, %c0_18], %21 {strides = array<i32>} : memref<128x128xbf16, #tpu.memory_space<vmem>>, vector<128x128xbf16>,
    } else {
    }
    return
  }
  func.func @transform_0(%arg0: i32, %arg1: i32, %arg2: i32) -> (i32, i32) {
    %c0_i32 = arith.constant 0 : i32
    return %arg0, %arg2 : i32, i32
  }
  func.func @transform_1(%arg0: i32, %arg1: i32, %arg2: i32) -> (i32, i32) {
    %c0_i32 = arith.constant 0 : i32
    return %arg2, %arg1 : i32, i32
  }
  func.func @transform_2(%arg0: i32, %arg1: i32, %arg2: i32) -> (i32, i32) {
    %c0_i32 = arith.constant 0 : i32
    %c0_i32_0 = arith.constant 0 : i32
    return %c0_i32, %arg1 : i32, i32
  }
  func.func @transform_3(%arg0: i32, %arg1: i32, %arg2: i32) -> (i32, i32) {
    %c0_i32 = arith.constant 0 : i32
    %c0_i32_0 = arith.constant 0 : i32
    return %c0_i32, %arg1 : i32, i32
  }
  func.func @transform_4(%arg0: i32, %arg1: i32, %arg2: i32) -> (i32, i32) {
    %c0_i32 = arith.constant 0 : i32
    return %arg0, %arg1 : i32, i32
  }
}

</mosaic_0001>

<bundles_post_ra>
// kernel: tpu_custom_call.1
= control target key start
LH: loop header
LB: loop body
LE: loop exit
PB: predicated region body
PF: predicated region fallthrough
CT: control target
= control target key end

     0   :  { %9 = vsyncpa [#allocation4], 0  ;;  %s1618_s0 = inlined_call_operand.hbm [shape: bf16[2048,128], index: 0, kind: input, shape index: {}]   ;;  %s1619_s1 = inlined_call_operand.hbm [shape: bf16[128,128], index: 1, kind: input, shape index: {}]   ;;  %s1620_s2 = inlined_call_operand.vmem [shape: f32[1,128], index: 2, kind: input, shape index: {}]   ;;  %s1621_s3 = inlined_call_operand.vmem [shape: f32[1,128], index: 3, kind: input, shape index: {}]   ;;  %s1622_s4 = inlined_call_operand.hbm [shape: bf16[2048,128], index: 4, kind: output, shape index: {}]  }
   0x1   :  { %11 = vsyncpa [#allocation4 + $0x1], 0 }
   0x2   :  { %12 = vsyncpa [#allocation7], 0 }
   0x3   :  { %13 = vsyncpa [#allocation5], 0 }
   0x4   :  { %15 = vsyncpa [#allocation5 + $0x1], 0  ;;  %s1346_s15 = smov 0   ;;  %s1348_s16 = smov 0  }
   0x5   :  { %s1350_s17 = smov 0   ;;  %s1352_s18 = smov 0  }
   0x6   :  { %s1354_s19 = smov 0   ;;  %s1356_s20 = smov 0  }
   0x7 LB: > { %s893_s21 = sadd.s32 4294967295, %s1312_s20   ;;  %s894_s22 = sadd.s32 4294967294, %s1312_s20   ;;  %s1312_s20 = sphi %s1356_s20, %s21_s20   ;;  %s1308_s19 = sphi %s1354_s19, %s1645_s19   ;;  %s1304_s18 = sphi %s1352_s18, %s1644_s18   ;;  %s1300_s17 = sphi %s1350_s17, %s1643_s17   ;;  %s1296_s16 = sphi %s1348_s16, %s1642_s16   ;;  %s1292_s15 = sphi %s1346_s15, %s1641_s15  }
   0x8   : > { %p62_p0 = scmp.ne.s32.totalorder %s1296_s16, %s1292_s15  ;;  %p1380_p1 = scmp.eq.s32.totalorder %s893_s21, 0 }
   0x9   : > { %p1384_p2 = scmp.eq.s32.totalorder %s893_s21, 15  ;;  %p174_p3 = scmp.eq.s32.totalorder %s894_s22, 15 }
   0xa   : > { %s1627_s23 = scalar_select %p1380_p1, 1, 0 }
   0xb   : > { %s1628_s24 = scalar_select %p1384_p2, 1, 0 }
   0xc   : > { %p1390_p4 = por %p1380_p1, %p62_p0  ;;  %p895_p5 = scmp.ge.s32.totalorder %s1312_s20, 1 }
   0xd   : > { %p1395_p6 = por %p174_p3, %p62_p0  ;;  %p181_p7 = scmp.lt.s32.totalorder %s1312_s20, 17 }
   0xe   : > { %s1629_s25 = scalar_select %p1390_p4, 1, 0 }
   0xf   : > { %s1630_s26 = scalar_select %p1395_p6, 1, 0 }
  0x10   : > { %p1400_p8 = pnand %p895_p5, %p181_p7  ;;  %s1314_s28 = smov [#allocation6]  }
  0x11   : > { %s197_s29 = sshll.u32 %s1314_s28, 4  ;;  %s40_s5 = sadd.s32 1, %s1308_s19  ;;  %s198_s29 = int_to_ptr.vmem [resolvable:$true] %s197_s29 }
  0x12   : > { %s1631_s27 = scalar_select %p1400_p8, 1, 0 }
  0x13   : > { %p1083_p9 = pneg %p1400_p8  ;;  %s1168_s8 = scalar_lea.hbm %s1619_s1, 1024 }
  0x14   : > { %p1169_p11 = scmp.ne.s32.totalorder %s1619_s1, %s1168_s8  ;;  %p1175_p3 = scmp.lt.u32.totalorder %s1168_s8, %s1619_s1 }
  0x15   : > { %p1408_p10 = pnand %p1083_p9, %p1380_p1 }
  0x17   : > { %p1170_p12 = pneg %p1408_p10 }
  0x19   : > { %p1171_p13 = pnand %p1170_p12, %p1169_p11 }
  0x1b   : > { %p1172_p0 = pneg %p1171_p13 }
  0x1d   : > { %p1177_p5 = pnand %p1175_p3, %p1172_p0 }
  0x1f   : > { %1180 = shalt.err (!%p1177_p5)
}
  0x20   : > { %s1181_s13 = scalar_lea.vmem %s198_s29, 1024  ;;  %p1189_p1 = scmp.lt.s32.totalorder %s198_s29, %s198_s29 }
  0x21   : > { %p1182_p7 = scmp.ne.s32.totalorder %s198_s29, %s1181_s13  ;;  %p1190_p4 = scmp.lt.s32.totalorder %s1181_s13, %s1181_s13 }
  0x23   : > { %p1184_p9 = pnand %p1182_p7, %p1170_p12  ;;  %p1191_p8 = por %p1190_p4, %p1189_p1 }
  0x25   : > { %p1185_p6 = pneg %p1184_p9 }
  0x27   : > { %p1192_p2 = pnand %p1191_p8, %p1185_p6 }
  0x29   : > { %1195 = shalt.err (!%p1192_p2)
}
  0x2a   : > { %s1315_s14 = smov 64   ;;  %s1316_s21 = smov 4  }
  0x2b   : > { %1086 = dma.hbm_to_vmem [thread:$0]  (!%p1408_p10), %s1619_s1, 1024, %s198_s29, [#allocation7], %s1315_s14, %s1315_s14, %s1316_s21  }
  0x2c   : > { %p42_p1 = scmp.ge.s32.totalorder %s40_s5, 16  ;;  %s49_s6 = sadd.s32 1, %s1300_s17 }
  0x2d   : > { %p56_p2 = scmp.ne.s32.totalorder %s1300_s17, %s1296_s16  ;;  %p57_p4 = scmp.eq.s32.totalorder %s1312_s20, 0 }
  0x2e   : > { %s1647_s5 = smov (%p42_p1, %s40_s5), 0  ;;  %p1634_p8 = scmp.ne.s32.totalorder %s1628_s24, 0 }
  0x2f   : > { %p1438_p6 = por %p57_p4, %p56_p2  ;;  %s44_s8 = ssub.s32 %s1308_s19, %s1647_s5 }
  0x30   : > { %p1444_p11 = por %p1634_p8, %p56_p2  ;;  %p1096_p12 = scmp.lt.s32.totalorder %s1312_s20, 16 }
  0x31   : > { %p47_p10 = scmp.eq.s32.totalorder %s44_s8, 0  ;;  %s223_s29 = sand.u32 1, %s1300_s17  }
  0x32   : > { %s900_s9 = sshll.u32 %s223_s29, 6  ;;  %s946_s11 = sshll.u32 %s1308_s19, 10 }
  0x33   : > { %s1453_s10 = scalar_select %p47_p10, %s1300_s17, %s49_s6  }
  0x34   : > { %s1459_s22 = scalar_lea.hbm %s1618_s0, %s946_s11  ;;  %s227_s24 = scalar_lea.vmem [#allocation3], %s900_s9 }
  0x35   : > { %s235_s28 = sshll.u32 %s227_s24, 4  ;;  %p1465_p13 = pnand %p1096_p12, %p1438_p6  ;;  %s1461_s28 = int_to_ptr.vmem [resolvable:$true] %s235_s28 }
  0x36   : > { %s1469_s6 = scalar_lea.sflag [#allocation4], %s223_s29  ;;  %s1196_s12 = scalar_lea.hbm %s1459_s22, 1024 }
  0x37   : > { %p1197_p0 = scmp.ne.s32.totalorder %s1459_s22, %s1196_s12  ;;  %p1198_p3 = pneg %p1465_p13 }
  0x38   : > { %s1201_s7 = scalar_lea.hbm %s1618_s0, 16384  ;;  %p1202_p9 = scmp.lt.u32.totalorder %s1459_s22, %s1618_s0 }
  0x39   : > { %p1199_p5 = pnand %p1198_p3, %p1197_p0  ;;  %p1203_p1 = scmp.lt.u32.totalorder %s1201_s7, %s1196_s12 }
  0x3a   : > { %p1205_p4 = scmp.lt.u32.totalorder %s1196_s12, %s1459_s22 }
  0x3b   : > { %p1200_p7 = pneg %p1199_p5  ;;  %p1204_p2 = por %p1203_p1, %p1202_p9 }
  0x3d   : > { %p1206_p6 = por %p1205_p4, %p1204_p2 }
  0x3f   : > { %p1207_p8 = pnand %p1206_p6, %p1200_p7 }
  0x41   : > { %1210 = shalt.err (!%p1207_p8)
}
  0x42   : > { %s1211_s29 = scalar_lea.vmem %s1461_s28, 1024  ;;  %s1317_s9 = smov [#allocation3]  }
  0x43   : > { %p1212_p12 = scmp.ne.s32.totalorder %s1461_s28, %s1211_s29  ;;  %s1216_s11 = sshll.u32 %s1317_s9, 4  ;;  %s1217_s11 = int_to_ptr.vmem [resolvable:$false] %s1216_s11 }
  0x44   : > { %s1218_s13 = scalar_lea.vmem %s1217_s11, 2048  ;;  %p1219_p5 = scmp.lt.s32.totalorder %s1461_s28, %s1217_s11 }
  0x45   : > { %p1214_p10 = pnand %p1212_p12, %p1198_p3  ;;  %p1220_p9 = scmp.lt.s32.totalorder %s1218_s13, %s1211_s29 }
  0x47   : > { %p1215_p0 = pneg %p1214_p10  ;;  %p1221_p1 = por %p1220_p9, %p1219_p5 }
  0x49   : > { %p1222_p2 = pnand %p1221_p1, %p1215_p0 }
  0x4b   : > { %1225 = shalt.err (!%p1222_p2)
}
  0x4c   : > { %1090 = dma.hbm_to_vmem [thread:$0]  (!%p1465_p13), %s1459_s22, 1024, %s1461_s28, %s1469_s6, %s1315_s14, %s1315_s14, %s1316_s21  }
  0x4d   : > { %p1637_p3 = scmp.ne.s32.totalorder %s1631_s27, 0 }
  0x4e   : > { %s1503_s12 = sand.u32 (!%p1637_p3), 1, %s1296_s16   ;;  %p1638_p7 = scmp.ne.s32.totalorder (!%p1637_p3), %s1629_s25, 0 }
  0x4f   : > { %247 = sbr.rel (%p1637_p3) target bundleno = 370 (0x172), region = 36  ;;  %s904_s7 = sshll.u32 (!%p1637_p3), %s1503_s12, 6 }
  0x50   : > { %s250_s24 = scalar_lea.sflag (!%p1637_p3), [#allocation4], %s1503_s12  ;;  %s1509_s8 = scalar_lea.vmem (!%p1637_p3), [#allocation3], %s904_s7 }
  0x56   : > { %1279 = dma.done.wait (%p1638_p7), %s250_s24, 1024  }
  0x57   : > { %1281 = vsyncadd (%p1638_p7), %s250_s24, 4294966272  ;;  %p1639_p13 = scmp.ne.s32.totalorder %s1627_s23, 0 }
  0x59   : > { %1283 = dma.done.wait (%p1639_p13), [#allocation7], 1024  }
  0x5a   : > { %1285 = vsyncadd (%p1639_p13), [#allocation7], 4294966272  ;;  %v1152_v0 = vld [vmem:[#allocation6] sm:$0xff]   ;;  %v1153_v1 = vld [vmem:[#allocation6 + $0x8] sm:$0xff]   ;;  %s1545_s21 = scalar_lea.vmem [#allocation8], %s904_s7  ;;  %s963_s22 = sshll.u32 %s1304_s18, 10 }
  0x5b   : > { %1027 = vmatprep.subr.bf16.mxu0 %v1152_v0  ;;  %1059 = vmatprep.subr.bf16.mxu1 %v1152_v0  ;;  %v1154_v2 = vld [vmem:[#allocation6 + $0x10] sm:$0xff]   ;;  %v1155_v3 = vld [vmem:[#allocation6 + $0x18] sm:$0xff]   ;;  %v1160_v4 = vld [vmem:[%s1509_s8] sm:$0xff]   ;;  %s767_s28 = sshll.u32 %s1545_s21, 4  ;;  %s1564_s18 = scalar_lea.hbm %s1622_s4, %s963_s22  ;;  %s1566_s28 = int_to_ptr.vmem [resolvable:$true] %s767_s28 }
  0x5c   : > { %1028 = vmatpush3.bf16.msra.mxu0 %v1152_v0  ;;  %1067 = vmatpush3.bf16.msra.mxu1 %v1152_v0  ;;  %v1161_v5 = vld [vmem:[%s1509_s8 + $0x20] sm:$0xff]   ;;  %v1157_v7 = vld [vmem:[#allocation6 + $0x28] sm:$0xff]   ;;  %v1158_v8 = vld [vmem:[#allocation6 + $0x30] sm:$0xff]   ;;  %s753_s9 = scalar_lea.sflag [#allocation5], %s1503_s12  ;;  %s1226_s11 = scalar_lea.vmem %s1566_s28, 1024 }
  0x5d   : > { %1029 = vmatprep.subr.bf16.mxu0 %v1153_v1  ;;  %1060 = vmatprep.subr.bf16.mxu1 %v1153_v1  ;;  %v1156_v6 = vld [vmem:[#allocation6 + $0x20] sm:$0xff]   ;;  %v1159_v9 = vld [vmem:[#allocation6 + $0x38] sm:$0xff]   ;;  %v1162_v10 = vld [vmem:[%s1509_s8 + $0x8] sm:$0xff]   ;;  %p1227_p4 = scmp.ne.s32.totalorder %s1566_s28, %s1226_s11  ;;  %s1318_s13 = smov [#allocation8]  }
  0x5e   : > { %1043 = vmatprep.mubr.bf16.mxu0 %v1160_v4  ;;  %1051 = vmatprep.mubr.bf16.mxu1 %v1161_v5  ;;  %v1163_v11 = vld [vmem:[%s1509_s8 + $0x28] sm:$0xff]   ;;  %v1164_v12 = vld [vmem:[%s1509_s8 + $0x10] sm:$0xff]   ;;  %v1166_v14 = vld [vmem:[%s1509_s8 + $0x18] sm:$0xff]   ;;  %s1230_s7 = sshll.u32 %s1318_s13, 4  ;;  %s1231_s7 = int_to_ptr.vmem [resolvable:$false] %s1230_s7 }
  0x5f   : > { %v1165_v13 = vld [vmem:[%s1509_s8 + $0x30] sm:$0xff]   ;;  %v1167_v15 = vld [vmem:[%s1509_s8 + $0x38] sm:$0xff]   ;;  %v923_v16 = vld [vmem:[%s1620_s2] ss:$0 sm:$0xff]  ;;  %p1228_p6 = pnand %p1227_p4, %p1444_p11  ;;  %s1232_s24 = scalar_lea.vmem %s1231_s7, 2048 }
  0x60   : > { %1030 = vmatpush3.bf16.msra.mxu0 %v1153_v1  ;;  %1068 = vmatpush3.bf16.msra.mxu1 %v1153_v1  ;;  %v1533_v18 = vld [vmem:[%s1621_s3] ss:$0 sm:$0xff]  ;;  %p1233_p12 = scmp.lt.s32.totalorder %s1566_s28, %s1231_s7  ;;  %p1234_p10 = scmp.lt.s32.totalorder %s1232_s24, %s1226_s11 }
  0x61   : > { %1031 = vmatprep.subr.bf16.mxu0 %v1154_v2  ;;  %1061 = vmatprep.subr.bf16.mxu1 %v1154_v2  ;;  %p1229_p8 = pneg %p1228_p6 }
  0x62   : > { %p1235_p0 = por %p1234_p10, %p1233_p12 }
  0x64   : > { %1032 = vmatpush3.bf16.msra.mxu0 %v1154_v2  ;;  %1069 = vmatpush3.bf16.msra.mxu1 %v1154_v2  ;;  %p1236_p5 = pnand %p1235_p0, %p1229_p8 }
  0x65   : > { %1033 = vmatprep.subr.bf16.mxu0 %v1155_v3  ;;  %1062 = vmatprep.subr.bf16.mxu1 %v1155_v3 }
  0x68   : > { %1034 = vmatpush3.bf16.msra.mxu0 %v1155_v3  ;;  %1070 = vmatpush3.bf16.msra.mxu1 %v1155_v3 }
  0x69   : > { %1035 = vmatprep.subr.bf16.mxu0 %v1156_v6  ;;  %1063 = vmatprep.subr.bf16.mxu1 %v1156_v6 }
  0x6c   : > { %1036 = vmatpush3.bf16.msra.mxu0 %v1156_v6  ;;  %1071 = vmatpush3.bf16.msra.mxu1 %v1156_v6 }
  0x6d   : > { %1037 = vmatprep.subr.bf16.mxu0 %v1157_v7  ;;  %1064 = vmatprep.subr.bf16.mxu1 %v1157_v7 }
  0x70   : > { %1038 = vmatpush3.bf16.msra.mxu0 %v1157_v7  ;;  %1072 = vmatpush3.bf16.msra.mxu1 %v1157_v7 }
  0x71   : > { %1039 = vmatprep.subr.bf16.mxu0 %v1158_v8  ;;  %1065 = vmatprep.subr.bf16.mxu1 %v1158_v8 }
  0x74   : > { %1040 = vmatpush3.bf16.msra.mxu0 %v1158_v8  ;;  %1073 = vmatpush3.bf16.msra.mxu1 %v1158_v8 }
  0x75   : > { %1041 = vmatprep.subr.bf16.mxu0 %v1159_v9  ;;  %1066 = vmatprep.subr.bf16.mxu1 %v1159_v9 }
  0x78   : > { %1042 = vmatpush3.bf16.msra.mxu0 %v1159_v9  ;;  %1074 = vmatpush3.bf16.msra.mxu1 %v1159_v9 }
  0x7b   : > { %1044 = vmatmul.mubr.bf16.vlgmr.msra.gmra.mrb[0].mxu0 %v1162_v10  ;;  %1052 = vmatmul.mubr.bf16.vlgmr.msra.gmra.mrb[0].mxu1 %v1163_v11 }
  0x7c   : > { %1047 = vmatprep.mubr.bf16.mxu0 %v1164_v12  ;;  %1055 = vmatprep.mubr.bf16.mxu1 %v1165_v13 }
  0x83   : > { %1048 = vmatmul.mubr.bf16.gmra.mrb[4].mxu0 %v1166_v14  ;;  %1056 = vmatmul.mubr.bf16.gmra.mrb[4].mxu1 %v1167_v15 }
 0x14e   : > { %v1045_v17 = vpop.f32.mrb[0].mxu0  ;;  %v1053_v19 = vpop.f32.mrb[0].mxu1 }
 0x14f   : > { %v619_v20 = vmul.f32 %v1045_v17, %v923_v16  ;;  %v627_v21 = vmul.f32 %v1053_v19, %v923_v16  ;;  %v496_v22 = vpop.f32.mrb[1].mxu0  ;;  %v528_v23 = vpop.f32.mrb[1].mxu1 }
 0x150   : > { %v617_v24 = vmul.f32 %v923_v16, %v496_v22  ;;  %v625_v25 = vmul.f32 %v923_v16, %v528_v23  ;;  %v1046_v26 = vpop.f32.mrb[2].mxu0  ;;  %v1054_v27 = vpop.f32.mrb[2].mxu1 }
 0x151   : > { %v642_v28 = vadd.f32 %v1533_v18, %v619_v20  ;;  %v650_v29 = vadd.f32 %v1533_v18, %v627_v21  ;;  %v620_v30 = vmul.f32 %v1046_v26, %v923_v16  ;;  %v628_v31 = vmul.f32 %v1054_v27, %v923_v16  ;;  %v499_v32 = vpop.f32.mrb[3].mxu0  ;;  %v531_v33 = vpop.f32.mrb[3].mxu1 }
 0x152   : > { %v640_v34 = vadd.f32 %v1533_v18, %v617_v24  ;;  %v648_v35 = vadd.f32 %v1533_v18, %v625_v25  ;;  %v618_v36 = vmul.f32 %v923_v16, %v499_v32  ;;  %v626_v37 = vmul.f32 %v923_v16, %v531_v33 }
 0x153   : > { %v643_v38 = vadd.f32 %v1533_v18, %v620_v30  ;;  %v651_v39 = vadd.f32 %v1533_v18, %v628_v31  ;;  %v658_v42 = vmax.f32 %v642_v28, 0.0  ;;  %v666_v43 = vmax.f32 %v650_v29, 0.0 }
 0x154   : > { %v641_v40 = vadd.f32 %v1533_v18, %v618_v36  ;;  %v649_v41 = vadd.f32 %v1533_v18, %v626_v37  ;;  %v656_v46 = vmax.f32 %v640_v34, 0.0  ;;  %v664_v47 = vmax.f32 %v648_v35, 0.0 }
 0x155   : > { %v659_v44 = vmax.f32 %v643_v38, 0.0  ;;  %v667_v45 = vmax.f32 %v651_v39, 0.0 }
 0x156   : > { %v657_v48 = vmax.f32 %v641_v40, 0.0  ;;  %v665_v49 = vmax.f32 %v649_v41, 0.0  ;;  %v1049_v50 = vpop.f32.mrb[4].mxu0  ;;  %v1057_v51 = vpop.f32.mrb[4].mxu1 }
 0x157   : > { %v972_v52 = vpack.c.bf16 %v659_v44, %v658_v42  ;;  %v992_v53 = vpack.c.bf16 %v667_v45, %v666_v43  ;;  %v623_v54 = vmul.f32 %v1049_v50, %v923_v16  ;;  %v631_v55 = vmul.f32 %v1057_v51, %v923_v16  ;;  %v512_v56 = vpop.f32.mrb[5].mxu0  ;;  %v544_v57 = vpop.f32.mrb[5].mxu1 }
 0x158   : > { %v967_v58 = vpack.c.bf16 %v657_v48, %v656_v46  ;;  %v987_v59 = vpack.c.bf16 %v665_v49, %v664_v47  ;;  %v621_v60 = vmul.f32 %v923_v16, %v512_v56  ;;  %v629_v61 = vmul.f32 %v923_v16, %v544_v57  ;;  %v1050_v62 = vpop.f32.mrb[6].mxu0  ;;  %v1058_v63 = vpop.f32.mrb[6].mxu1 }
 0x159   : > { %1004 = vst [vmem:[%s1545_s21 + $0x8] sm:$0xff] %v972_v52   ;;  %1008 = vst [vmem:[%s1545_s21 + $0x28] sm:$0xff] %v992_v53   ;;  %v646_v0 = vadd.f32 %v1533_v18, %v623_v54  ;;  %v654_v1 = vadd.f32 %v1533_v18, %v631_v55  ;;  %v624_v2 = vmul.f32 %v1050_v62, %v923_v16  ;;  %v515_v4 = vpop.f32.mrb[7].mxu0  ;;  %v547_v5 = vpop.f32.mrb[7].mxu1 }
 0x15a   : > { %v632_v3 = vmul.f32 %v1058_v63, %v923_v16  ;;  %968 = vst [vmem:[%s1545_s21] sm:$0xff] %v967_v58   ;;  %1007 = vst [vmem:[%s1545_s21 + $0x20] sm:$0xff] %v987_v59   ;;  %v644_v6 = vadd.f32 %v1533_v18, %v621_v60  ;;  %v652_v7 = vadd.f32 %v1533_v18, %v629_v61 }
 0x15b   : > { %v622_v8 = vmul.f32 %v923_v16, %v515_v4  ;;  %v630_v9 = vmul.f32 %v923_v16, %v547_v5  ;;  %v647_v10 = vadd.f32 %v1533_v18, %v624_v2  ;;  %v662_v14 = vmax.f32 %v646_v0, 0.0 }
 0x15c   : > { %v655_v11 = vadd.f32 %v1533_v18, %v632_v3  ;;  %v670_v15 = vmax.f32 %v654_v1, 0.0  ;;  %v660_v16 = vmax.f32 %v644_v6, 0.0  ;;  %v668_v20 = vmax.f32 %v652_v7, 0.0 }
 0x15d   : > { %v645_v12 = vadd.f32 %v1533_v18, %v622_v8  ;;  %v653_v13 = vadd.f32 %v1533_v18, %v630_v9  ;;  %v663_v17 = vmax.f32 %v647_v10, 0.0 }
 0x15e   : > { %v671_v19 = vmax.f32 %v655_v11, 0.0 }
 0x15f   : > { %v661_v21 = vmax.f32 %v645_v12, 0.0  ;;  %v669_v22 = vmax.f32 %v653_v13, 0.0  ;;  %v982_v23 = vpack.c.bf16 %v663_v17, %v662_v14 }
 0x160   : > { %v1002_v24 = vpack.c.bf16 %v671_v19, %v670_v15 }
 0x161   : > { %v977_v18 = vpack.c.bf16 %v661_v21, %v660_v16  ;;  %v997_v25 = vpack.c.bf16 %v669_v22, %v668_v20  ;;  %1006 = vst [vmem:[%s1545_s21 + $0x18] sm:$0xff] %v982_v23  }
 0x162   : > { %1010 = vst [vmem:[%s1545_s21 + $0x38] sm:$0xff] %v1002_v24  }
 0x163   : > { %1005 = vst [vmem:[%s1545_s21 + $0x10] sm:$0xff] %v977_v18   ;;  %1009 = vst [vmem:[%s1545_s21 + $0x30] sm:$0xff] %v997_v25  }
 0x164   : > { %1239 = shalt.err (!%p1236_p5)
}
 0x165   : > { %s1240_s8 = scalar_lea.hbm %s1564_s18, 1024  ;;  %s1244_s27 = scalar_lea.hbm %s1622_s4, 16384 }
 0x166   : > { %p1241_p9 = scmp.ne.s32.totalorder %s1564_s18, %s1240_s8  ;;  %p1245_p3 = scmp.lt.u32.totalorder %s1564_s18, %s1622_s4 }
 0x167   : > { %p1246_p7 = scmp.lt.u32.totalorder %s1244_s27, %s1240_s8  ;;  %p1248_p4 = scmp.lt.u32.totalorder %s1240_s8, %s1564_s18 }
 0x168   : > { %p1242_p1 = pnand %p1241_p9, %p1444_p11 }
 0x169   : > { %p1247_p13 = por %p1246_p7, %p1245_p3 }
 0x16a   : > { %p1243_p2 = pneg %p1242_p1 }
 0x16b   : > { %p1249_p6 = por %p1248_p4, %p1247_p13 }
 0x16d   : > { %p1250_p8 = pnand %p1249_p6, %p1243_p2 }
 0x16f   : > { %1253 = shalt.err (!%p1250_p8)
}
 0x170   : > { %s1319_s22 = smov 64   ;;  %s1320_s6 = smov 4  }
 0x171   : > { %1081 = dma.vmem_to_hbm [thread:$0]  (%p1444_p11), %s1566_s28, 1024, %s1564_s18, %s753_s9, %s1319_s22, %s1319_s22, %s1320_s6  }
 0x172 PF: > { %p1098_p12 = scmp.ge.s32.totalorder %s1312_s20, 2  ;;  %s782_s29 = sand.u32 1, %s1292_s15  }
 0x173   : > { %p1640_p10 = scmp.ne.s32.totalorder %s1630_s26, 0  ;;  %s783_s11 = scalar_lea.sflag [#allocation5], %s782_s29 }
 0x175   : > { %p1092_p0 = pnand %p1098_p12, %p1640_p10 }
 0x177   : > { %1287 = dma.done.wait (!%p1092_p0), %s783_s11, 1024  }
 0x178   : > { %1289 = vsyncadd (!%p1092_p0), %s783_s11, 4294966272  ;;  %s21_s20 = sadd.s32 1, %s1312_s20   ;;  %s1641_s15 = smov %s1296_s16 }
 0x179   : > { %p18_p5 = scmp.ge.s32.totalorder %s21_s20, 18   ;;  %s1642_s16 = smov %s1300_s17 }
 0x17a   : > { %s1643_s17 = smov %s1453_s10  ;;  %s1644_s18 = smov %s1308_s19 }
 0x17b   : > { %s1645_s19 = smov %s1647_s5  ;;  %20 = sbr.rel (!%p18_p5) target bundleno = 7 (0x7), region = 100 }
 0x182   :  { %788 = vsyncpa [#allocation4], 1 }
 0x183   :  { %790 = vsyncpa [#allocation4 + $0x1], 1 }
 0x184   :  { %791 = vsyncpa [#allocation7], 1 }
 0x185   :  { %792 = vsyncpa [#allocation5], 1 }
 0x186   :  { %794 = vsyncpa [#allocation5 + $0x1], 1 }

</bundles_post_ra>
